<compile_context>
chip_gen: v7x
topology: tpu7x:2x2x1
jax: 0.10.0
libtpu: 0.0.40
codegen_flags: <defaults>
</compile_context>

<pallas_src>
import jax
import jax.numpy as jnp
from jax.experimental import pallas as pl
from jax.experimental.pallas import tpu as pltpu


# -----------------------------------------------------------------------------
# Pallas kernel: elementwise image normalization for both frames.
# -----------------------------------------------------------------------------
_SCALE = 2.0 / 255.0  # x * (2/255) - 1 == 2*(x/255) - 1 (to 1 ulp in f32)


def _normalize_kernel(ref_ref, cur_ref, ref_out, cur_out):
    # Cast inside the kernel (input may be uint8/float); output is float32.
    ref_out[...] = ref_ref[...].astype(jnp.float32) * _SCALE - 1.0
    cur_out[...] = cur_ref[...].astype(jnp.float32) * _SCALE - 1.0


# -----------------------------------------------------------------------------
# Tiling plan: zero-copy lane-dense 2D view + block sizing.
# -----------------------------------------------------------------------------
_LANE = 128
_SUBLANE = 8
_TARGET_BLOCK_BYTES = 2 * 1024 * 1024  # ~2 MiB of f32 per buffer (near roofline)


def _plan_lane_dense_tiling(n):
    """Return (rows, cols, block_rows, needs_pad).

    Prefers cols in {1024, 512, 256, 128} that exactly divide n so that the
    reshape to (rows, cols) is layout-only (zero-copy).  Falls back to padding
    only when n has no multiple-of-128 divisor.
    """
    cols = None
    for c in (1024, 512, 256, 128):
        if n % c == 0:
            cols = c
            break
    if cols is None:
        cols = _LANE
        rows = -(-n // cols)  # ceil; tail padded in the wrapper (rare path)
        needs_pad = True
    else:
        rows = n // cols
        needs_pad = False

    max_br = max(_SUBLANE, (_TARGET_BLOCK_BYTES // 4) // cols)
    if rows <= max_br:
        block_rows = rows  # single block; full-dim block is always legal
    else:
        # Largest multiple-of-8 divisor of rows that fits the VMEM budget.
        block_rows = None
        start = max_br - (max_br % _SUBLANE)
        for br in range(start, 0, -_SUBLANE):
            if rows % br == 0:
                block_rows = br
                break
        if block_rows is None:
            block_rows = start  # non-dividing; Pallas masks the edge block
    return rows, cols, block_rows, needs_pad


def _build_call(rows, cols, block_rows, in_dtype, semantics):
    spec = pl.BlockSpec((block_rows, cols), lambda i: (i, 0))
    n_elems = rows * cols
    in_bytes = n_elems * jnp.dtype(in_dtype).itemsize
    out_bytes = n_elems * 4
    return pl.pallas_call(
        _normalize_kernel,
        out_shape=(
            jax.ShapeDtypeStruct((rows, cols), jnp.float32),
            jax.ShapeDtypeStruct((rows, cols), jnp.float32),
        ),
        grid=(pl.cdiv(rows, block_rows),),
        in_specs=[spec, spec],
        out_specs=(spec, spec),
        compiler_params=pltpu.CompilerParams(
            dimension_semantics=semantics,
            vmem_limit_bytes=48 * 1024 * 1024,
        ),
        cost_estimate=pl.CostEstimate(
            flops=4 * n_elems,          # mul + sub per element, two images
            transcendentals=0,
            bytes_accessed=2 * (in_bytes + out_bytes),
        ),
    )


def _candidate_semantics():
    """CORE_PARALLEL first on v7x (2 TensorCores/chip); plain 'parallel' otherwise."""
    cands = []
    try:
        kind = jax.devices()[0].device_kind.lower()
    except Exception:
        kind = ""
    if "7" in kind:
        cands.append((pltpu.CORE_PARALLEL,))
    cands.append(("parallel",))
    return cands


_CHOSEN_SEMANTICS = None  # cache the semantics that compiled successfully


def _run_normalize(ref_2d, cur_2d, rows, cols, block_rows, in_dtype):
    global _CHOSEN_SEMANTICS
    if _CHOSEN_SEMANTICS is not None:
        call = _build_call(rows, cols, block_rows, in_dtype, _CHOSEN_SEMANTICS)
        return call(ref_2d, cur_2d)
    last_err = None
    for sem in _candidate_semantics():
        try:
            call = _build_call(rows, cols, block_rows, in_dtype, sem)
            outs = call(ref_2d, cur_2d)
            jax.block_until_ready(outs)  # surface compile/runtime errors here
            _CHOSEN_SEMANTICS = sem
            return outs
        except Exception as e:  # fall back (e.g. CORE_PARALLEL unsupported)
            last_err = e
    raise last_err


def normalize_images(ref_image, cur_image):
    assert ref_image.shape == cur_image.shape
    orig_shape = ref_image.shape
    n = 1
    for d in orig_shape:
        n *= d

    rows, cols, block_rows, needs_pad = _plan_lane_dense_tiling(n)
    n_pad = rows * cols

    def to_2d(x):
        x = x.reshape(-1)
        if needs_pad:
            x = jnp.pad(x, (0, n_pad - n))  # only when n has no x128 divisor
        return x.reshape(rows, cols)

    ref_2d = to_2d(ref_image)
    cur_2d = to_2d(cur_image)

    ref_out_2d, cur_out_2d = _run_normalize(
        ref_2d, cur_2d, rows, cols, block_rows, ref_image.dtype)

    def from_2d(y):
        if needs_pad:
            return y.reshape(-1)[:n].reshape(orig_shape)
        return y.reshape(orig_shape)  # zero-copy reshape on the common path

    return from_2d(ref_out_2d), from_2d(cur_out_2d)


# -----------------------------------------------------------------------------
# Raft module (JAX side).
# -----------------------------------------------------------------------------
class Raft:
    def __init__(self, in_channels, hidden_channels, feature_channels,
                 context_channels, correlation_pyramid_levels, correlation_radius):
        self.hidden_dim = hidden_channels
        self.context_dim = context_channels
        self.correlation_pyramid_levels = correlation_pyramid_levels
        self.correlation_radius = correlation_radius
        # TODO(synk): FeatureEncoder / ContextEncoder / CorrelationPyramid are not
        # defined in the reference source and their outputs never reach the
        # forward() return value — left unimplemented.

    def initialize_flow(self, image):
        batch_size, _, height, width = image.shape
        height = height // 8
        width = width // 8
        yy, xx = jnp.meshgrid(jnp.arange(height), jnp.arange(width), indexing="ij")
        # torch.stack(meshgrid[::-1], dim=0) -> (x, y) ordering, float32
        coords = jnp.stack([xx, yy], axis=0).astype(jnp.float32)
        coords = jnp.broadcast_to(coords[None], (batch_size, 2, height, width))
        return coords, coords

    def forward(self, ref_image, cur_image):
        # Hot path: elementwise normalization, done in the Pallas kernel.
        ref_norm, cur_norm = normalize_images(ref_image, cur_image)

        # Flow initialization (index generation; plain-JAX glue).
        ref_pixel_locations, cur_pixel_locations = self.initialize_flow(ref_norm)
        for _ in range(10):
            # .detach() is a value no-op; replicate with stop_gradient semantics.
            cur_pixel_locations = jax.lax.stop_gradient(cur_pixel_locations)

        # The reference forward returns the normalized images.
        return ref_norm, cur_norm


# -----------------------------------------------------------------------------
# Demo / smoke test.
# -----------------------------------------------------------------------------
if __name__ == "__main__":
    key = jax.random.PRNGKey(0)
    k1, k2 = jax.random.split(key)

    B, C, H, W = 2, 3, 16, 16   # small shapes; H, W divisible by 8 as forward implies
    ref_image = jax.random.uniform(k1, (B, C, H, W), jnp.float32, 0.0, 255.0)
    cur_image = jax.random.uniform(k2, (B, C, H, W), jnp.float32, 0.0, 255.0)

    model = Raft(in_channels=C, hidden_channels=32, feature_channels=32,
                 context_channels=32, correlation_pyramid_levels=4,
                 correlation_radius=4)

    ref_out, cur_out = model.forward(ref_image, cur_image)
    jax.block_until_ready((ref_out, cur_out))

    # Cross-check against the reference elementwise formula.
    ref_expected = 2.0 * (ref_image / 255.0) - 1.0
    cur_expected = 2.0 * (cur_image / 255.0) - 1.0
    assert jnp.allclose(ref_out, ref_expected, atol=1e-5)
    assert jnp.allclose(cur_out, cur_expected, atol=1e-5)
    assert ref_out.shape == (B, C, H, W) and ref_out.dtype == jnp.float32
    assert cur_out.shape == (B, C, H, W) and cur_out.dtype == jnp.float32

    print("KERNEL_OK")
</pallas_src>

<mosaic_0001>
module attributes {stable_mosaic.version = 11 : i64} {
  func.func @_normalize_kernel(%arg0: i32, %arg1: memref<3x512xf32, #tpu.memory_space<vmem>>, %arg2: memref<3x512xf32, #tpu.memory_space<vmem>>, %arg3: memref<3x512xf32, #tpu.memory_space<vmem>>, %arg4: memref<3x512xf32, #tpu.memory_space<vmem>>) attributes {dimension_semantics = [#tpu.dimension_semantics<parallel>], iteration_bounds = array<i64: 1>, scalar_prefetch = 0 : i64, scratch_operands = 0 : i64, tpu.core_type = #tpu.core_type<tc>, window_params = [{transform_indices = @transform_0, window_bounds = array<i64: 3, 512>}, {transform_indices = @transform_1, window_bounds = array<i64: 3, 512>}, {transform_indices = @transform_2, window_bounds = array<i64: 3, 512>}, {transform_indices = @transform_3, window_bounds = array<i64: 3, 512>}]} {
    %c0 = arith.constant 0 : index
    %c0_0 = arith.constant 0 : index
    %0 = vector.load %arg1[%c0, %c0_0] : memref<3x512xf32, #tpu.memory_space<vmem>>, vector<3x512xf32>
    %cst = arith.constant 0.00784313772 : f32
    %1 = vector.broadcast %cst : f32 to vector<3x512xf32>
    %2 = arith.mulf %0, %1 : vector<3x512xf32>
    %cst_1 = arith.constant 1.000000e+00 : f32
    %3 = vector.broadcast %cst_1 : f32 to vector<3x512xf32>
    %4 = arith.subf %2, %3 : vector<3x512xf32>
    %c0_2 = arith.constant 0 : index
    %c0_3 = arith.constant 0 : index
    %5 = vector.load %arg3[%c0_2, %c0_3] : memref<3x512xf32, #tpu.memory_space<vmem>>, vector<3x512xf32>
    tpu.vector_store %arg3[%c0_2, %c0_3], %4 {strides = array<i32>} : memref<3x512xf32, #tpu.memory_space<vmem>>, vector<3x512xf32>,
    %c0_4 = arith.constant 0 : index
    %c0_5 = arith.constant 0 : index
    %6 = vector.load %arg2[%c0_4, %c0_5] : memref<3x512xf32, #tpu.memory_space<vmem>>, vector<3x512xf32>
    %cst_6 = arith.constant 0.00784313772 : f32
    %7 = vector.broadcast %cst_6 : f32 to vector<3x512xf32>
    %8 = arith.mulf %6, %7 : vector<3x512xf32>
    %cst_7 = arith.constant 1.000000e+00 : f32
    %9 = vector.broadcast %cst_7 : f32 to vector<3x512xf32>
    %10 = arith.subf %8, %9 : vector<3x512xf32>
    %c0_8 = arith.constant 0 : index
    %c0_9 = arith.constant 0 : index
    %11 = vector.load %arg4[%c0_8, %c0_9] : memref<3x512xf32, #tpu.memory_space<vmem>>, vector<3x512xf32>
    tpu.vector_store %arg4[%c0_8, %c0_9], %10 {strides = array<i32>} : memref<3x512xf32, #tpu.memory_space<vmem>>, vector<3x512xf32>,
    return
  }
  func.func @transform_0(%arg0: i32) -> (i32, i32) {
    %c0_i32 = arith.constant 0 : i32
    %c0_i32_0 = arith.constant 0 : i32
    return %arg0, %c0_i32 : i32, i32
  }
  func.func @transform_1(%arg0: i32) -> (i32, i32) {
    %c0_i32 = arith.constant 0 : i32
    %c0_i32_0 = arith.constant 0 : i32
    return %arg0, %c0_i32 : i32, i32
  }
  func.func @transform_2(%arg0: i32) -> (i32, i32) {
    %c0_i32 = arith.constant 0 : i32
    %c0_i32_0 = arith.constant 0 : i32
    return %arg0, %c0_i32 : i32, i32
  }
  func.func @transform_3(%arg0: i32) -> (i32, i32) {
    %c0_i32 = arith.constant 0 : i32
    %c0_i32_0 = arith.constant 0 : i32
    return %arg0, %c0_i32 : i32, i32
  }
}

</mosaic_0001>

<bundles_post_ra>
// kernel: tpu_custom_call.1
= control target key start
LH: loop header
LB: loop body
LE: loop exit
PB: predicated region body
PF: predicated region fallthrough
CT: control target
= control target key end

     0   :  { %9 = vsyncpa [#allocation3], 0  ;;  %s261_s0 = inlined_call_operand.hbm [shape: f32[3,512], index: 0, kind: input, shape index: {}]   ;;  %s262_s1 = inlined_call_operand.hbm [shape: f32[3,512], index: 1, kind: input, shape index: {}]   ;;  %s263_s2 = inlined_call_operand.hbm [shape: f32[3,512], index: 2, kind: output, shape index: {0}]   ;;  %s264_s3 = inlined_call_operand.hbm [shape: f32[3,512], index: 3, kind: output, shape index: {1}]  }
   0x1   :  { %10 = vsyncpa [#allocation6], 0 }
   0x2   :  { %11 = vsyncpa [#allocation4], 0 }
   0x3   :  { %12 = vsyncpa [#allocation9], 0  ;;  %s189_s12 = smov [#allocation2]   ;;  %s190_s14 = smov [#allocation5]  }
   0x4   :  { %s19_s13 = sshll.u32 %s189_s12, 4  ;;  %s29_s15 = sshll.u32 %s190_s14, 4  ;;  %s20_s13 = int_to_ptr.vmem [resolvable:$true] %s19_s13  ;;  %s30_s15 = int_to_ptr.vmem [resolvable:$true] %s29_s15 }
   0x5   :  { %s93_s18 = scalar_lea.hbm %s261_s0, 256 }
   0x6   :  { %p94_p0 = scmp.ne.s32.totalorder %s261_s0, %s93_s18  ;;  %p97_p1 = scmp.lt.u32.totalorder %s93_s18, %s261_s0 }
   0x8   :  { %p99_p2 = pnand %p97_p1, %p94_p0 }
   0xa   :  { %102 = shalt.err (!%p99_p2)
}
   0xb   :  { %s103_s23 = scalar_lea.vmem %s20_s13, 256  ;;  %p108_p4 = scmp.lt.s32.totalorder %s20_s13, %s20_s13 }
   0xc   :  { %p104_p3 = scmp.ne.s32.totalorder %s20_s13, %s103_s23  ;;  %p109_p5 = scmp.lt.s32.totalorder %s103_s23, %s103_s23 }
   0xe   :  { %p110_p6 = por %p109_p5, %p108_p4 }
  0x10   :  { %p111_p7 = pnand %p110_p6, %p104_p3 }
  0x12   :  { %114 = shalt.err (!%p111_p7)
}
  0x13   :  { %22 = dma.hbm_to_vmem [thread:$0]  %s261_s0, 256, %s20_s13, [#allocation3]  }
  0x14   :  { %s115_s28 = scalar_lea.hbm %s262_s1, 256 }
  0x15   :  { %p116_p8 = scmp.ne.s32.totalorder %s262_s1, %s115_s28  ;;  %p119_p9 = scmp.lt.u32.totalorder %s115_s28, %s262_s1 }
  0x17   :  { %p121_p10 = pnand %p119_p9, %p116_p8 }
  0x19   :  { %124 = shalt.err (!%p121_p10)
}
  0x1a   :  { %s125_s6 = scalar_lea.vmem %s30_s15, 256  ;;  %p130_p12 = scmp.lt.s32.totalorder %s30_s15, %s30_s15 }
  0x1b   :  { %p126_p11 = scmp.ne.s32.totalorder %s30_s15, %s125_s6  ;;  %p131_p13 = scmp.lt.s32.totalorder %s125_s6, %s125_s6 }
  0x1d   :  { %p132_p0 = por %p131_p13, %p130_p12 }
  0x1f   :  { %p133_p1 = pnand %p132_p0, %p126_p11 }
  0x21   :  { %136 = shalt.err (!%p133_p1)
}
  0x22   :  { %32 = dma.hbm_to_vmem [thread:$0]  %s262_s1, 256, %s30_s15, [#allocation6]  }
  0x23   :  { %181 = dma.done.wait [#allocation3], 256  }
  0x24   :  { %182 = vsyncadd [#allocation3], 4294967040 }
  0x25   :  { %183 = dma.done.wait [#allocation6], 256  }
  0x26   :  { %184 = vsyncadd [#allocation6], 4294967040  ;;  %s191_s8 = smov [#allocation7]   ;;  %v39_v0 = vld [vmem:[#allocation2] sm:$0x77]  ;;  %s192_s10 = smov [#allocation8]  }
  0x27   :  { %s61_s9 = sshll.u32 %s191_s8, 4  ;;  %v40_v1 = vld [vmem:[#allocation2 + $0x8] sm:$0x77]  ;;  %v47_v2 = vld [vmem:[#allocation5] sm:$0x77]  ;;  %s71_s11 = sshll.u32 %s192_s10, 4  ;;  %s62_s9 = int_to_ptr.vmem [resolvable:$true] %s61_s9  ;;  %s72_s11 = int_to_ptr.vmem [resolvable:$true] %s71_s11 }
  0x28   :  { %v41_v3 = vmul.f32 0.007843138, %v39_v0  ;;  %v42_v4 = vmul.f32 0.007843138, %v40_v1  ;;  %v49_v5 = vmul.f32 0.007843138, %v47_v2  ;;  %p142_p3 = scmp.lt.s32.totalorder %s62_s9, %s62_s9 }
  0x29   :  { %v48_v6 = vld [vmem:[#allocation5 + $0x8] sm:$0x77]  ;;  %s137_s1 = scalar_lea.vmem %s62_s9, 256 }
  0x2a   :  { %v85_v7 = vadd.f32 -1.0, %v41_v3  ;;  %v86_v8 = vadd.f32 -1.0, %v42_v4  ;;  %v87_v9 = vadd.f32 -1.0, %v49_v5  ;;  %v50_v10 = vmul.f32 0.007843138, %v48_v6  ;;  %p138_p2 = scmp.ne.s32.totalorder %s62_s9, %s137_s1  ;;  %p143_p4 = scmp.lt.s32.totalorder %s137_s1, %s137_s1 }
  0x2c   :  { %45 = vst [vmem:[#allocation7] sm:$0x77] %v85_v7  ;;  %46 = vst [vmem:[#allocation7 + $0x8] sm:$0x77] %v86_v8  ;;  %v88_v11 = vadd.f32 -1.0, %v50_v10  ;;  %p144_p5 = por %p143_p4, %p142_p3 }
  0x2d   :  { %53 = vst [vmem:[#allocation8] sm:$0x77] %v87_v9 }
  0x2e   :  { %p145_p6 = pnand %p144_p5, %p138_p2 }
  0x30   :  { %148 = shalt.err (!%p145_p6)
}
  0x31   :  { %s149_s14 = scalar_lea.hbm %s263_s2, 256 }
  0x32   :  { %p150_p7 = scmp.ne.s32.totalorder %s263_s2, %s149_s14  ;;  %p153_p8 = scmp.lt.u32.totalorder %s149_s14, %s263_s2 }
  0x34   :  { %p155_p9 = pnand %p153_p8, %p150_p7 }
  0x36   :  { %158 = shalt.err (!%p155_p9)
}
  0x37   :  { %64 = dma.vmem_to_hbm [thread:$0]  %s62_s9, 256, %s263_s2, [#allocation4]   ;;  %54 = vst [vmem:[#allocation8 + $0x8] sm:$0x77] %v88_v11 }
  0x38   :  { %s159_s21 = scalar_lea.vmem %s72_s11, 256  ;;  %p164_p11 = scmp.lt.s32.totalorder %s72_s11, %s72_s11 }
  0x39   :  { %p160_p10 = scmp.ne.s32.totalorder %s72_s11, %s159_s21  ;;  %p165_p12 = scmp.lt.s32.totalorder %s159_s21, %s159_s21 }
  0x3b   :  { %p166_p13 = por %p165_p12, %p164_p11 }
  0x3d   :  { %p167_p0 = pnand %p166_p13, %p160_p10 }
  0x3f   :  { %170 = shalt.err (!%p167_p0)
}
  0x40   :  { %s171_s24 = scalar_lea.hbm %s264_s3, 256 }
  0x41   :  { %p172_p1 = scmp.ne.s32.totalorder %s264_s3, %s171_s24  ;;  %p175_p2 = scmp.lt.u32.totalorder %s171_s24, %s264_s3 }
  0x43   :  { %p177_p3 = pnand %p175_p2, %p172_p1 }
  0x45   :  { %180 = shalt.err (!%p177_p3)
}
  0x46   :  { %74 = dma.vmem_to_hbm [thread:$0]  %s72_s11, 256, %s264_s3, [#allocation9]  }
  0x47   :  { %185 = dma.done.wait [#allocation4], 256  }
  0x48   :  { %186 = vsyncadd [#allocation4], 4294967040 }
  0x49   :  { %187 = dma.done.wait [#allocation9], 256  }
  0x4a   :  { %188 = vsyncadd [#allocation9], 4294967040 }
  0x4b   :  { %81 = vsyncpa [#allocation3], 1 }
  0x4c   :  { %82 = vsyncpa [#allocation6], 1 }
  0x4d   :  { %83 = vsyncpa [#allocation4], 1 }
  0x4e   :  { %84 = vsyncpa [#allocation9], 1 }

</bundles_post_ra>
